<compile_context>
chip_gen: v7x
topology: tpu7x:2x2x1
jax: 0.10.0
libtpu: 0.0.40
codegen_flags: <defaults>
</compile_context>

<pallas_src>
import functools

import jax
import jax.numpy as jnp
from jax.experimental import pallas as pl
from jax.experimental.pallas import tpu as pltpu

_LANE = 128


def _round_up(v, m):
    return (v + m - 1) // m * m


def _sublane_multiple(dtype):
    return {4: 8, 2: 16, 1: 32}.get(jnp.dtype(dtype).itemsize, 8)


def _vmem_capacity_bytes():
    try:
        return int(pltpu.get_tpu_info().vmem_capacity_bytes)
    except Exception:
        return 64 << 20  # conservative (v7x per-TC)


def _num_tensorcores():
    try:
        kind = jax.devices()[0].device_kind.lower()
    except Exception:
        return 1
    return 2 if "v7" in kind else 1


def prepare_params(params, mxu_dtype=jnp.bfloat16):
    """One-time host-side prep (hoisted out of the forward pass):
    weights (in_f, out_f) cast to the MXU dtype; biases kept f32 (1, out_f)."""
    return [(jnp.asarray(w, mxu_dtype), jnp.asarray(b, jnp.float32).reshape(1, -1))
            for (w, b) in params]


def _mlp_kernel(n_layers, mxu_dtype, *refs):
    """Fused MLP. refs = (x_ref, w0, b0, w1, b1, ..., out_ref)."""
    x_ref = refs[0]
    out_ref = refs[-1]

    h = x_ref[...].astype(mxu_dtype)               # MXU operands in param dtype
    for l in range(n_layers):
        w = refs[1 + 2 * l][...]                   # (d_in, d_out), mxu_dtype
        b = refs[2 + 2 * l][...]                   # (1, d_out), f32
        acc = jnp.dot(h, w, preferred_element_type=jnp.float32) + b
        if l < n_layers - 1:
            acc = jnp.maximum(acc, 0.0)            # ReLU
            # dropout -> identity (eval mode)
            h = acc.astype(mxu_dtype)
        else:
            out_ref[...] = acc.astype(out_ref.dtype)


def autoencoder_forward(x, prepared_params, *, tm=None):
    """x: (B, in_dim); prepared_params: output of prepare_params()."""
    B, in_dim = x.shape
    n_layers = len(prepared_params)
    dims = [prepared_params[0][0].shape[0]] + [w.shape[1] for (w, _) in prepared_params]
    out_dim = dims[-1]
    assert dims[0] == in_dim, "first layer in_features must match x"
    assert out_dim == in_dim, "autoencoder output dim must equal input dim"
    mxu_dtype = jnp.dtype(prepared_params[0][0].dtype)

    # ---- resident-weight VMEM footprint (layout-padded, conservative) --------
    sub_w = _sublane_multiple(mxu_dtype)
    w_bytes = sum(_round_up(dims[l], sub_w) * _round_up(dims[l + 1], _LANE)
                  * mxu_dtype.itemsize for l in range(n_layers))
    b_bytes = sum(8 * _round_up(dims[l + 1], _LANE) * 4 for l in range(n_layers))

    x_item = jnp.dtype(x.dtype).itemsize
    max_dpad = max(_round_up(d, _LANE) for d in dims)

    def footprint(tm_):
        tile = (2 * tm_ * _round_up(in_dim, _LANE) * x_item
                + 2 * tm_ * _round_up(out_dim, _LANE) * x_item)
        acts = (n_layers + 2) * tm_ * max_dpad * 4   # generous f32 headroom
        return w_bytes + b_bytes + tile + acts

    vmem_cap = _vmem_capacity_bytes()
    vmem_budget = vmem_cap - max(8 << 20, vmem_cap // 8)  # leave compiler scratch room

    # ---- batch tiling ---------------------------------------------------------
    sub_x = _sublane_multiple(x.dtype)
    if tm is None:
        tm = min(512, _round_up(B, sub_x))
        ntc = _num_tensorcores()
        # Split the batch only when there is a second TensorCore to feed (v7x).
        if ntc > 1 and B >= ntc * sub_x and _round_up(B, tm) // tm < ntc:
            tm = max(sub_x, _round_up(pl.cdiv(B, ntc), sub_x))
    else:
        tm = _round_up(tm, sub_x)
    while footprint(tm) > vmem_budget and tm > sub_x:
        tm = max(sub_x, _round_up(tm // 2, sub_x))

    B_pad = _round_up(B, tm)
    grid = (B_pad // tm,)
    x_p = x if B_pad == B else jnp.zeros((B_pad, in_dim), x.dtype).at[:B].set(x)

    # ---- specs: x/out tiled over batch, weights/biases whole-array in VMEM ----
    flat_args = [x_p]
    in_specs = [pl.BlockSpec((tm, in_dim), lambda i: (i, 0))]
    for (w, b) in prepared_params:
        flat_args += [w, b]
        in_specs += [pl.BlockSpec(memory_space=pltpu.MemorySpace.VMEM),
                     pl.BlockSpec(memory_space=pltpu.MemorySpace.VMEM)]
    out_spec = pl.BlockSpec((tm, out_dim), lambda i: (i, 0))

    needed = footprint(tm)
    vmem_limit = int(min(vmem_budget, max(2 * needed, 32 << 20)))

    flops = 2 * B_pad * sum(dims[l] * dims[l + 1] for l in range(n_layers))
    bytes_accessed = (B_pad * in_dim * x_item + w_bytes + b_bytes
                      + B_pad * out_dim * x_item)
    cost = pl.CostEstimate(flops=flops, transcendentals=0,
                           bytes_accessed=bytes_accessed)

    kernel = functools.partial(_mlp_kernel, n_layers, mxu_dtype)

    out = pl.pallas_call(
        kernel,
        out_shape=jax.ShapeDtypeStruct((B_pad, out_dim), x.dtype),
        grid_spec=pltpu.PrefetchScalarGridSpec(
            num_scalar_prefetch=0,
            grid=grid,
            in_specs=in_specs,
            out_specs=out_spec,
        ),
        compiler_params=pltpu.CompilerParams(
            dimension_semantics=("parallel",),
            vmem_limit_bytes=vmem_limit,
        ),
        cost_estimate=cost,
    )(*flat_args)

    return out if B_pad == B else out[:B]


def init_params(key, in_dim, hid_dim, n_layers):
    """Deterministic synthetic params; layer l: Linear(d_in -> d_out), W:(in_f,out_f)."""
    dims = [in_dim] + [hid_dim] * (n_layers - 1) + [in_dim]
    params = []
    for l in range(n_layers):
        key, kw, kb = jax.random.split(key, 3)
        d_in, d_out = dims[l], dims[l + 1]
        scale = 1.0 / jnp.sqrt(jnp.float32(d_in))
        w = jax.random.uniform(kw, (d_in, d_out), jnp.float32, -scale, scale)
        b = jax.random.uniform(kb, (d_out,), jnp.float32, -scale, scale)
        params.append((w, b))
    return params


def reference_forward(x, params):
    h = x
    for l, (w, b) in enumerate(params):
        h = h @ w + b
        if l < len(params) - 1:
            h = jnp.maximum(h, 0.0)
    return h


if __name__ == "__main__":
    key = jax.random.PRNGKey(0)
    batch, in_dim, hid_dim, n_layers = 16, 16, 32, 3

    kx, kp = jax.random.split(key)
    x = jax.random.normal(kx, (batch, in_dim), jnp.float32)
    params = init_params(kp, in_dim, hid_dim, n_layers)
    ref = reference_forward(x, params)

    # f32 MXU path (numerically faithful to the reference)
    out_f32 = jax.block_until_ready(
        autoencoder_forward(x, prepare_params(params, jnp.float32)))
    assert out_f32.shape == (batch, in_dim)
    assert jnp.allclose(out_f32, ref, atol=1e-4, rtol=1e-4), "f32 mismatch vs reference"

    # bf16 MXU path (default fast path: native MXU rate, half weight VMEM)
    out_bf16 = jax.block_until_ready(
        autoencoder_forward(x, prepare_params(params, jnp.bfloat16)))
    assert out_bf16.shape == (batch, in_dim)
    assert jnp.allclose(out_bf16, ref, atol=5e-2, rtol=5e-2), "bf16 mismatch vs reference"

    print("KERNEL_OK")
</pallas_src>

<mosaic_0001>
module attributes {stable_mosaic.version = 11 : i64} {
  func.func @_mlp_kernel(%arg0: i32, %arg1: memref<16x16xf32, #tpu.memory_space<vmem>>, %arg2: memref<16x32xf32, #tpu.memory_space<vmem>>, %arg3: memref<1x32xf32, #tpu.memory_space<vmem>>, %arg4: memref<32x32xf32, #tpu.memory_space<vmem>>, %arg5: memref<1x32xf32, #tpu.memory_space<vmem>>, %arg6: memref<32x16xf32, #tpu.memory_space<vmem>>, %arg7: memref<1x16xf32, #tpu.memory_space<vmem>>, %arg8: memref<16x16xf32, #tpu.memory_space<vmem>>) attributes {dimension_semantics = [#tpu.dimension_semantics<parallel>], iteration_bounds = array<i64: 1>, scalar_prefetch = 0 : i64, scratch_operands = 0 : i64, tpu.core_type = #tpu.core_type<tc>, window_params = [{transform_indices = @transform_0, window_bounds = array<i64: 16, 16>}, {pipeline_mode = #tpu.pipeline_mode<synchronous>, transform_indices = @transform_1, window_bounds = array<i64: 16, 32>}, {pipeline_mode = #tpu.pipeline_mode<synchronous>, transform_indices = @transform_2, window_bounds = array<i64: 1, 32>}, {pipeline_mode = #tpu.pipeline_mode<synchronous>, transform_indices = @transform_3, window_bounds = array<i64: 32, 32>}, {pipeline_mode = #tpu.pipeline_mode<synchronous>, transform_indices = @transform_4, window_bounds = array<i64: 1, 32>}, {pipeline_mode = #tpu.pipeline_mode<synchronous>, transform_indices = @transform_5, window_bounds = array<i64: 32, 16>}, {pipeline_mode = #tpu.pipeline_mode<synchronous>, transform_indices = @transform_6, window_bounds = array<i64: 1, 16>}, {transform_indices = @transform_7, window_bounds = array<i64: 16, 16>}]} {
    %c0 = arith.constant 0 : index
    %c0_0 = arith.constant 0 : index
    %0 = vector.load %arg1[%c0, %c0_0] : memref<16x16xf32, #tpu.memory_space<vmem>>, vector<16x16xf32>
    %c0_1 = arith.constant 0 : index
    %c0_2 = arith.constant 0 : index
    %1 = vector.load %arg2[%c0_1, %c0_2] : memref<16x32xf32, #tpu.memory_space<vmem>>, vector<16x32xf32>
    %c0_3 = arith.constant 0 : index
    %c0_4 = arith.constant 0 : index
    %2 = vector.load %arg3[%c0_3, %c0_4] : memref<1x32xf32, #tpu.memory_space<vmem>>, vector<1x32xf32>
    %cst = arith.constant dense<0.000000e+00> : vector<16x32xf32>
    %3 = tpu.matmul %0, %1, %cst {dimension_numbers = #tpu.dot_dimension_numbers<[1], [0], [0], [1], [0, 0, 1, 1], [], []>} : vector<16x16xf32>, vector<16x32xf32>, vector<16x32xf32> -> vector<16x32xf32>
    %4 = vector.broadcast %2 : vector<1x32xf32> to vector<16x32xf32>
    %5 = arith.addf %3, %4 : vector<16x32xf32>
    %cst_5 = arith.constant 0.000000e+00 : f32
    %6 = vector.broadcast %cst_5 : f32 to vector<16x32xf32>
    %7 = arith.maximumf %5, %6 : vector<16x32xf32>
    %c0_6 = arith.constant 0 : index
    %c0_7 = arith.constant 0 : index
    %8 = vector.load %arg4[%c0_6, %c0_7] : memref<32x32xf32, #tpu.memory_space<vmem>>, vector<32x32xf32>
    %c0_8 = arith.constant 0 : index
    %c0_9 = arith.constant 0 : index
    %9 = vector.load %arg5[%c0_8, %c0_9] : memref<1x32xf32, #tpu.memory_space<vmem>>, vector<1x32xf32>
    %cst_10 = arith.constant dense<0.000000e+00> : vector<16x32xf32>
    %10 = tpu.matmul %7, %8, %cst_10 {dimension_numbers = #tpu.dot_dimension_numbers<[1], [0], [0], [1], [0, 0, 1, 1], [], []>} : vector<16x32xf32>, vector<32x32xf32>, vector<16x32xf32> -> vector<16x32xf32>
    %11 = vector.broadcast %9 : vector<1x32xf32> to vector<16x32xf32>
    %12 = arith.addf %10, %11 : vector<16x32xf32>
    %cst_11 = arith.constant 0.000000e+00 : f32
    %13 = vector.broadcast %cst_11 : f32 to vector<16x32xf32>
    %14 = arith.maximumf %12, %13 : vector<16x32xf32>
    %c0_12 = arith.constant 0 : index
    %c0_13 = arith.constant 0 : index
    %15 = vector.load %arg6[%c0_12, %c0_13] : memref<32x16xf32, #tpu.memory_space<vmem>>, vector<32x16xf32>
    %c0_14 = arith.constant 0 : index
    %c0_15 = arith.constant 0 : index
    %16 = vector.load %arg7[%c0_14, %c0_15] : memref<1x16xf32, #tpu.memory_space<vmem>>, vector<1x16xf32>
    %cst_16 = arith.constant dense<0.000000e+00> : vector<16x16xf32>
    %17 = tpu.matmul %14, %15, %cst_16 {dimension_numbers = #tpu.dot_dimension_numbers<[1], [0], [0], [1], [0, 0, 1, 1], [], []>} : vector<16x32xf32>, vector<32x16xf32>, vector<16x16xf32> -> vector<16x16xf32>
    %18 = vector.broadcast %16 : vector<1x16xf32> to vector<16x16xf32>
    %19 = arith.addf %17, %18 : vector<16x16xf32>
    %c0_17 = arith.constant 0 : index
    %c0_18 = arith.constant 0 : index
    %20 = vector.load %arg8[%c0_17, %c0_18] : memref<16x16xf32, #tpu.memory_space<vmem>>, vector<16x16xf32>
    tpu.vector_store %arg8[%c0_17, %c0_18], %19 {strides = array<i32>} : memref<16x16xf32, #tpu.memory_space<vmem>>, vector<16x16xf32>,
    return
  }
  func.func @transform_0(%arg0: i32) -> (i32, i32) {
    %c0_i32 = arith.constant 0 : i32
    %c0_i32_0 = arith.constant 0 : i32
    return %arg0, %c0_i32 : i32, i32
  }
  func.func @transform_1(%arg0: i32) -> (i32, i32) {
    %c0_i32 = arith.constant 0 : i32
    %c0_i32_0 = arith.constant 0 : i32
    %c0_i32_1 = arith.constant 0 : i32
    return %c0_i32, %c0_i32_0 : i32, i32
  }
  func.func @transform_2(%arg0: i32) -> (i32, i32) {
    %c0_i32 = arith.constant 0 : i32
    %c0_i32_0 = arith.constant 0 : i32
    %c0_i32_1 = arith.constant 0 : i32
    return %c0_i32, %c0_i32_0 : i32, i32
  }
  func.func @transform_3(%arg0: i32) -> (i32, i32) {
    %c0_i32 = arith.constant 0 : i32
    %c0_i32_0 = arith.constant 0 : i32
    %c0_i32_1 = arith.constant 0 : i32
    return %c0_i32, %c0_i32_0 : i32, i32
  }
  func.func @transform_4(%arg0: i32) -> (i32, i32) {
    %c0_i32 = arith.constant 0 : i32
    %c0_i32_0 = arith.constant 0 : i32
    %c0_i32_1 = arith.constant 0 : i32
    return %c0_i32, %c0_i32_0 : i32, i32
  }
  func.func @transform_5(%arg0: i32) -> (i32, i32) {
    %c0_i32 = arith.constant 0 : i32
    %c0_i32_0 = arith.constant 0 : i32
    %c0_i32_1 = arith.constant 0 : i32
    return %c0_i32, %c0_i32_0 : i32, i32
  }
  func.func @transform_6(%arg0: i32) -> (i32, i32) {
    %c0_i32 = arith.constant 0 : i32
    %c0_i32_0 = arith.constant 0 : i32
    %c0_i32_1 = arith.constant 0 : i32
    return %c0_i32, %c0_i32_0 : i32, i32
  }
  func.func @transform_7(%arg0: i32) -> (i32, i32) {
    %c0_i32 = arith.constant 0 : i32
    %c0_i32_0 = arith.constant 0 : i32
    return %arg0, %c0_i32 : i32, i32
  }
}

</mosaic_0001>

<bundles_post_ra>
// kernel: tpu_custom_call.1
= control target key start
LH: loop header
LB: loop body
LE: loop exit
PB: predicated region body
PF: predicated region fallthrough
CT: control target
= control target key end

     0   :  { %12 = vsyncpa [#allocation3], 0  ;;  %s589_s0 = inlined_call_operand.vmem [shape: f32[16,16], index: 0, kind: input, shape index: {}]   ;;  %s590_s1 = inlined_call_operand.hbm [shape: f32[16,32], index: 1, kind: input, shape index: {}]   ;;  %s591_s2 = inlined_call_operand.vmem [shape: f32[1,32], index: 2, kind: input, shape index: {}]   ;;  %s592_s3 = inlined_call_operand.vmem [shape: f32[32,32], index: 3, kind: input, shape index: {}]   ;;  %s593_s4 = inlined_call_operand.vmem [shape: f32[1,32], index: 4, kind: input, shape index: {}]   ;;  %s594_s5 = inlined_call_operand.vmem [shape: f32[32,16], index: 5, kind: input, shape index: {}]   ;;  %s595_s6 = inlined_call_operand.vmem [shape: f32[1,16], index: 6, kind: input, shape index: {}]   ;;  %s596_s7 = inlined_call_operand.hbm [shape: f32[16,16], index: 7, kind: output, shape index: {}]  }
   0x1   :  { %13 = vsyncpa [#allocation4], 0  ;;  %s468_s24 = smov [#allocation2]   ;;  %s420_s28 = scalar_lea.hbm %s590_s1, 256 }
   0x2   :  { %s21_s25 = sshll.u32 %s468_s24, 4  ;;  %p421_p0 = scmp.ne.s32.totalorder %s590_s1, %s420_s28  ;;  %s22_s25 = int_to_ptr.vmem [resolvable:$true] %s21_s25 }
   0x3   :  { %p424_p1 = scmp.lt.u32.totalorder %s420_s28, %s590_s1 }
   0x5   :  { %p426_p2 = pnand %p424_p1, %p421_p0 }
   0x7   :  { %429 = shalt.err (!%p426_p2)
}
   0x8   :  { %s430_s10 = scalar_lea.vmem %s22_s25, 256  ;;  %p435_p4 = scmp.lt.s32.totalorder %s22_s25, %s22_s25 }
   0x9   :  { %p431_p3 = scmp.ne.s32.totalorder %s22_s25, %s430_s10  ;;  %p436_p5 = scmp.lt.s32.totalorder %s430_s10, %s430_s10 }
   0xb   :  { %p437_p6 = por %p436_p5, %p435_p4 }
   0xd   :  { %p438_p7 = pnand %p437_p6, %p431_p3 }
   0xf   :  { %441 = shalt.err (!%p438_p7)
}
  0x10   :  { %s469_s11 = smov 128   ;;  %s470_s12 = smov 8  }
  0x11   :  { %27 = dma.hbm_to_vmem [thread:$0]  %s590_s1, 256, %s22_s25, [#allocation3], %s469_s11, %s469_s11, %s470_s12  }
  0x12   :  { %464 = dma.done.wait [#allocation3], 256  }
  0x13   :  { %465 = vsyncadd [#allocation3], 4294967040  ;;  %vm52_vm0 = vcmask 130048   ;;  %v43_v0 = vld [vmem:[#allocation2] sm:$0xff]  ;;  %v44_v1 = vld [vmem:[#allocation2 + $0x8] sm:$0xff]  ;;  %vm147_vm1 = vcmask 261120  }
  0x14   :  { %v41_v2 = vld [vmem:[%s589_s0] sm:$0xff]  ;;  %v396_v3 = vpack.c.bf16 %v44_v1, %v43_v0  ;;  %v137_v5 = vld [vmem:[%s592_s3 + $0x8] sm:$0xff]  ;;  %v138_v8 = vld [vmem:[%s592_s3 + $0x10] sm:$0xff] }
  0x15   :  { %371 = vmatprep.mubr.msk.f32.mxu0 %vm52_vm0, %v41_v2  ;;  %v136_v4 = vld [vmem:[%s592_s3] sm:$0xff]  ;;  %v42_v7 = vld [vmem:[%s589_s0 + $0x8] sm:$0xff]  ;;  %v139_v9 = vld [vmem:[%s592_s3 + $0x18] sm:$0xff] }
  0x16   :  { %v400_v6 = vpack.c.bf16 %v137_v5, %v136_v4  ;;  %397 = vmatprep.subr.bf16.mxu0 %v396_v3  ;;  %v404_v10 = vpack.c.bf16 %v139_v9, %v138_v8  ;;  %v231_v11 = vld [vmem:[%s594_s5] sm:$0xff]  ;;  %v232_v12 = vld [vmem:[%s594_s5 + $0x8] sm:$0xff]  ;;  %v233_v21 = vld [vmem:[%s594_s5 + $0x10] sm:$0xff] }
  0x17   :  { %399 = vmatpush3.bf16.msra.mxu0 %v396_v3  ;;  %v408_v13 = vpack.c.bf16 %v232_v12, %v231_v11  ;;  %v342_v14 = vld [vmem:[%s591_s2] ss:$0 sm:$0xff]  ;;  %v234_v22 = vld [vmem:[%s594_s5 + $0x18] sm:$0xff]  ;;  %s471_s5 = smov [#allocation5]  }
  0x18   :  { %401 = vmatprep.subr.bf16.mxu1 %v400_v6  ;;  %v412_v23 = vpack.c.bf16 %v234_v22, %v233_v21  ;;  %v345_v24 = vld [vmem:[%s593_s4] ss:$0 sm:$0xff]  ;;  %s330_s16 = sshll.u32 %s471_s5, 4  ;;  %s331_s16 = int_to_ptr.vmem [resolvable:$true] %s330_s16 }
  0x19   :  { %403 = vmatpush3.bf16.msra.mxu1 %v400_v6  ;;  %409 = vmatprep.subr.bf16.mxu0 %v408_v13  ;;  %v348_v31 = vld [vmem:[%s595_s6] ss:$0 sm:$0xff]  ;;  %s442_s4 = scalar_lea.vmem %s331_s16, 256  ;;  %p447_p9 = scmp.lt.s32.totalorder %s331_s16, %s331_s16 }
  0x1a   :  { %372 = vmatmul.mubr.msk.f32.vlgmr.msra.gmra.mrb[0].mxu0 %vm52_vm0, %v42_v7  ;;  %405 = vmatprep.subr.bf16.mxu1 %v404_v10  ;;  %p443_p8 = scmp.ne.s32.totalorder %s331_s16, %s442_s4  ;;  %p448_p10 = scmp.lt.s32.totalorder %s442_s4, %s442_s4 }
  0x1b   :  { %411 = vmatpush3.bf16.msra.mxu0 %v408_v13 }
  0x1c   :  { %413 = vmatprep.subr.bf16.mxu0 %v412_v23  ;;  %p449_p11 = por %p448_p10, %p447_p9 }
  0x1d   :  { %407 = vmatpush3.bf16.msra.mxu1 %v404_v10 }
  0x1e   :  { %p450_p12 = pnand %p449_p11, %p443_p8 }
  0x1f   :  { %415 = vmatpush3.bf16.msra.mxu0 %v412_v23 }
  0xed   :  { %v373_v15 = vpop.f32.mrb[0].mxu0 }
  0xee   :  { %v131_v16 = vadd.f32 %v373_v15, %v342_v14  ;;  %v125_v17 = vpop.f32.mrb[1].mxu0 }
  0xef   :  { %v126_v18 = vadd.f32 %v342_v14, %v125_v17 }
  0xf0   :  { %v135_v20 = vmax.f32 %v131_v16, 0.0 }
  0xf1   :  { %v134_v19 = vmax.f32 %v126_v18, 0.0 }
  0xf3   :  { %382 = vmatprep.mubr.msk.f32.mxu1 %vm147_vm1, %v134_v19 }
  0xf4   :  { %383 = vmatmul.mubr.msk.f32.vlgmr.msra.gmra.mrb[0].mxu1 %vm147_vm1, %v135_v20 }
 0x1c7   :  { %v384_v25 = vpop.f32.mrb[0].mxu1 }
 0x1c8   :  { %v226_v26 = vadd.f32 %v384_v25, %v345_v24  ;;  %v220_v27 = vpop.f32.mrb[1].mxu1 }
 0x1c9   :  { %v221_v28 = vadd.f32 %v345_v24, %v220_v27 }
 0x1ca   :  { %v230_v30 = vmax.f32 %v226_v26, 0.0 }
 0x1cb   :  { %v229_v29 = vmax.f32 %v221_v28, 0.0 }
 0x1cd   :  { %393 = vmatprep.mubr.msk.f32.mxu0 %vm147_vm1, %v229_v29 }
 0x1ce   :  { %394 = vmatmul.mubr.msk.f32.vlgmr.msra.gmra.mrb[2].mxu0 %vm147_vm1, %v230_v30 }
 0x2a1   :  { %v395_v32 = vpop.f32.mrb[2].mxu0 }
 0x2a2   :  { %v320_v33 = vadd.f32 %v395_v32, %v348_v31  ;;  %v314_v34 = vpop.f32.mrb[3].mxu0 }
 0x2a3   :  { %v315_v35 = vadd.f32 %v348_v31, %v314_v34 }
 0x2a4   :  { %324 = vst.msk [vmem:[#allocation5 + $0x8] sm:$0xff] %vm52_vm0, %v320_v33 }
 0x2a5   :  { %323 = vst.msk [vmem:[#allocation5] sm:$0xff] %vm52_vm0, %v315_v35 }
 0x2a6   :  { %453 = shalt.err (!%p450_p12)
}
 0x2a7   :  { %s454_s18 = scalar_lea.hbm %s596_s7, 256 }
 0x2a8   :  { %p455_p13 = scmp.ne.s32.totalorder %s596_s7, %s454_s18  ;;  %p458_p0 = scmp.lt.u32.totalorder %s454_s18, %s596_s7 }
 0x2aa   :  { %p460_p1 = pnand %p458_p0, %p455_p13 }
 0x2ac   :  { %463 = shalt.err (!%p460_p1)
}
 0x2ad   :  { %336 = dma.vmem_to_hbm [thread:$0]  %s331_s16, 256, %s596_s7, [#allocation4], %s469_s11, %s469_s11, %s470_s12  }
 0x2ae   :  { %466 = dma.done.wait [#allocation4], 256  }
 0x2af   :  { %467 = vsyncadd [#allocation4], 4294967040 }
 0x2b0   :  { %340 = vsyncpa [#allocation3], 1 }
 0x2b1   :  { %341 = vsyncpa [#allocation4], 1 }

</bundles_post_ra>
